<compile_context>
chip_gen: v5e
topology: v5e:2x2
jax: 0.10.0
libtpu: 0.0.40
codegen_flags: <defaults>
</compile_context>

<pallas_src>
import functools

import jax
import jax.numpy as jnp
from jax.experimental import pallas as pl
from jax.experimental.pallas import tpu as pltpu


def _highway_kernel(x_ref, w_ref, b_ref, o_ref, *, e_pad):
    """One row-tile of the highway layer (fused proj+gate matmul).

    x_ref : (tm, Ep)     activation tile (Ep = eword padded to multiple of 128)
    w_ref : (Ep, 2*Ep)   fused [W_proj | W_gate] weights, stored (in, out)
    b_ref : (1, 2*Ep)    fused [b_proj | b_gate] biases
    o_ref : (tm, Ep)     output tile
    """
    x = x_ref[...]

    # Single MXU pass for both linear layers; f32 accumulate via
    # preferred_element_type (no explicit operand upcast).
    y = jnp.dot(x, w_ref[...], preferred_element_type=jnp.float32)
    y = y + b_ref[...].astype(jnp.float32)

    proj = jnp.maximum(y[:, :e_pad], 0.0)      # relu(x @ Wp + bp)
    gate = jax.nn.sigmoid(y[:, e_pad:])        # sigmoid(x @ Wg + bg)  (EUP slot)

    xf = x.astype(jnp.float32)
    # x + g*(proj - x) == g*proj + (1-g)*x, one fewer vector multiply.
    o_ref[...] = (xf + gate * (proj - xf)).astype(o_ref.dtype)


def _round_up(v, m):
    return -(-v // m) * m


@functools.partial(jax.jit, static_argnames=("row_tile",))
def highway_pallas(x, w_proj, b_proj, w_gate, b_gate, *, row_tile=None):
    """Highway forward.  x: (..., eword) -> (..., eword).

    Weights are stored as (in, out): the kernel computes x @ W, equal to
    torch's x @ W.T for a torch Linear weight of shape (out, in).
    """
    orig_shape = x.shape
    E = orig_shape[-1]
    x2d = x.reshape(-1, E)
    N = x2d.shape[0]
    dtype = x.dtype
    itemsize = jnp.dtype(dtype).itemsize

    # --- row tile selection ---------------------------------------------------
    if row_tile is None:
        target = 512                              # ~85% of HBM roofline for mem-bound tiles
        if N <= 8:
            row_tile = 8
        elif N <= 2 * target:
            # Split into (at least) 2 grid steps so v7x megacore can use both TCs.
            row_tile = _round_up(_round_up(N, 2) // 2, 8)
        else:
            row_tile = target
    row_tile = _round_up(int(row_tile), 8)

    # --- pad to lane-dense / tile-divisible shapes ------------------------------
    Ep = _round_up(E, 128)        # lane-dense feature dim -> unmasked vector stores
    Np = _round_up(N, row_tile)   # no divisibility assert; remainder rows padded
    grid = Np // row_tile

    x_p = jnp.pad(x2d, ((0, Np - N), (0, Ep - E)))

    def _pad_w(w):
        return jnp.pad(w, ((0, Ep - E), (0, Ep - E)))

    # Fused [proj | gate] weights & biases -> one MXU pass per tile.
    w_fused = jnp.concatenate([_pad_w(w_proj), _pad_w(w_gate)], axis=1)     # (Ep, 2Ep)
    b_fused = jnp.concatenate(
        [jnp.pad(b_proj.reshape(1, E), ((0, 0), (0, Ep - E))),
         jnp.pad(b_gate.reshape(1, E), ((0, 0), (0, Ep - E)))], axis=1)     # (1, 2Ep)

    # --- VMEM budget & cost estimate --------------------------------------------
    w_bytes = 2 * Ep * Ep * itemsize              # fused weight
    tile_bytes = row_tile * Ep * itemsize         # one x / out tile
    vmem_limit = int(min(max(2 * (w_bytes + 2 * tile_bytes) + (4 << 20), 32 << 20),
                         128 << 20))
    cost = pl.CostEstimate(
        flops=2 * Np * Ep * (2 * Ep),
        transcendentals=Np * Ep,
        bytes_accessed=(2 * Np * Ep + 2 * Ep * Ep + 2 * Ep) * itemsize,
    )

    out_p = pl.pallas_call(
        functools.partial(_highway_kernel, e_pad=Ep),
        out_shape=jax.ShapeDtypeStruct((Np, Ep), dtype),
        grid_spec=pltpu.PrefetchScalarGridSpec(
            num_scalar_prefetch=0,
            grid=(grid,),
            in_specs=[
                pl.BlockSpec((row_tile, Ep), lambda i: (i, 0)),   # x tile
                pl.BlockSpec((Ep, 2 * Ep), lambda i: (0, 0)),     # fused W (resident)
                pl.BlockSpec((1, 2 * Ep), lambda i: (0, 0)),      # fused bias
            ],
            out_specs=pl.BlockSpec((row_tile, Ep), lambda i: (i, 0)),
        ),
        compiler_params=pltpu.CompilerParams(
            dimension_semantics=("parallel",),
            vmem_limit_bytes=vmem_limit,
        ),
        cost_estimate=cost,
    )(x_p, w_fused, b_fused)

    return out_p[:N, :E].reshape(orig_shape)


def init_highway_params(key, eword, dtype=jnp.float32):
    """Deterministic init mimicking nn.Linear default (uniform +/- 1/sqrt(in))."""
    k1, k2, k3, k4 = jax.random.split(key, 4)
    bound = 1.0 / jnp.sqrt(jnp.float32(eword))
    # Stored as (in, out) so the kernel computes x @ W.
    w_proj = jax.random.uniform(k1, (eword, eword), dtype, -bound, bound)
    b_proj = jax.random.uniform(k2, (eword,), dtype, -bound, bound)
    w_gate = jax.random.uniform(k3, (eword, eword), dtype, -bound, bound)
    b_gate = jax.random.uniform(k4, (eword,), dtype, -bound, bound)
    return w_proj, b_proj, w_gate, b_gate


def highway_ref(x, w_proj, b_proj, w_gate, b_gate):
    """Pure-JAX reference matching the PyTorch forward."""
    proj = jax.nn.relu(x @ w_proj + b_proj)
    gate = jax.nn.sigmoid(x @ w_gate + b_gate)
    return gate * proj + (1.0 - gate) * x


if __name__ == "__main__":
    key = jax.random.PRNGKey(0)
    kx, kp = jax.random.split(key)

    batch, seq, eword = 2, 8, 32            # small shapes consistent with the module
    x = jax.random.normal(kx, (batch, seq, eword), jnp.float32)

    w_proj, b_proj, w_gate, b_gate = init_highway_params(kp, eword)

    out = highway_pallas(x, w_proj, b_proj, w_gate, b_gate)
    out = jax.block_until_ready(out)

    ref = highway_ref(x, w_proj, b_proj, w_gate, b_gate)
    assert out.shape == x.shape
    assert jnp.allclose(out, ref, atol=1e-5, rtol=1e-5), "mismatch vs reference"

    print("KERNEL_OK")
</pallas_src>

<mosaic_0001>
module attributes {stable_mosaic.version = 11 : i64} {
  func.func @_highway_kernel(%arg0: i32, %arg1: memref<8x128xf32, #tpu.memory_space<vmem>>, %arg2: memref<128x256xf32, #tpu.memory_space<vmem>>, %arg3: memref<1x256xf32, #tpu.memory_space<vmem>>, %arg4: memref<8x128xf32, #tpu.memory_space<vmem>>) attributes {dimension_semantics = [#tpu.dimension_semantics<parallel>], iteration_bounds = array<i64: 2>, scalar_prefetch = 0 : i64, scratch_operands = 0 : i64, tpu.core_type = #tpu.core_type<tc>, window_params = [{transform_indices = @transform_0, window_bounds = array<i64: 8, 128>}, {pipeline_mode = #tpu.pipeline_mode<synchronous>, transform_indices = @transform_1, window_bounds = array<i64: 128, 256>}, {pipeline_mode = #tpu.pipeline_mode<synchronous>, transform_indices = @transform_2, window_bounds = array<i64: 1, 256>}, {transform_indices = @transform_3, window_bounds = array<i64: 8, 128>}]} {
    %c0 = arith.constant 0 : index
    %c0_0 = arith.constant 0 : index
    %0 = vector.load %arg1[%c0, %c0_0] : memref<8x128xf32, #tpu.memory_space<vmem>>, vector<8x128xf32>
    %c0_1 = arith.constant 0 : index
    %c0_2 = arith.constant 0 : index
    %1 = vector.load %arg2[%c0_1, %c0_2] : memref<128x256xf32, #tpu.memory_space<vmem>>, vector<128x256xf32>
    %cst = arith.constant dense<0.000000e+00> : vector<8x256xf32>
    %2 = tpu.matmul %0, %1, %cst {dimension_numbers = #tpu.dot_dimension_numbers<[1], [0], [0], [1], [0, 0, 1, 1], [], []>} : vector<8x128xf32>, vector<128x256xf32>, vector<8x256xf32> -> vector<8x256xf32>
    %c0_3 = arith.constant 0 : index
    %c0_4 = arith.constant 0 : index
    %3 = vector.load %arg3[%c0_3, %c0_4] : memref<1x256xf32, #tpu.memory_space<vmem>>, vector<1x256xf32>
    %4 = vector.broadcast %3 : vector<1x256xf32> to vector<8x256xf32>
    %5 = arith.addf %2, %4 : vector<8x256xf32>
    %6 = vector.extract_strided_slice %5 {offsets = [0, 0], sizes = [8, 128], strides = [1, 1]} : vector<8x256xf32> to vector<8x128xf32>
    %cst_5 = arith.constant 0.000000e+00 : f32
    %7 = vector.broadcast %cst_5 : f32 to vector<8x128xf32>
    %8 = arith.maximumf %6, %7 : vector<8x128xf32>
    %9 = vector.extract_strided_slice %5 {offsets = [0, 128], sizes = [8, 128], strides = [1, 1]} : vector<8x256xf32> to vector<8x128xf32>
    %10 = arith.negf %9 : vector<8x128xf32>
    %11 = math.exp %10 : vector<8x128xf32>
    %cst_6 = arith.constant 1.000000e+00 : f32
    %12 = vector.broadcast %cst_6 : f32 to vector<8x128xf32>
    %13 = arith.addf %12, %11 : vector<8x128xf32>
    %14 = arith.divf %12, %13 : vector<8x128xf32>
    %15 = arith.subf %8, %0 : vector<8x128xf32>
    %16 = arith.mulf %14, %15 : vector<8x128xf32>
    %17 = arith.addf %0, %16 : vector<8x128xf32>
    %c0_7 = arith.constant 0 : index
    %c0_8 = arith.constant 0 : index
    %18 = vector.load %arg4[%c0_7, %c0_8] : memref<8x128xf32, #tpu.memory_space<vmem>>, vector<8x128xf32>
    tpu.vector_store %arg4[%c0_7, %c0_8], %17 {strides = array<i32>} : memref<8x128xf32, #tpu.memory_space<vmem>>, vector<8x128xf32>,
    return
  }
  func.func @transform_0(%arg0: i32) -> (i32, i32) {
    %c0_i32 = arith.constant 0 : i32
    %c0_i32_0 = arith.constant 0 : i32
    return %arg0, %c0_i32 : i32, i32
  }
  func.func @transform_1(%arg0: i32) -> (i32, i32) {
    %c0_i32 = arith.constant 0 : i32
    %c0_i32_0 = arith.constant 0 : i32
    %c0_i32_1 = arith.constant 0 : i32
    return %c0_i32, %c0_i32_0 : i32, i32
  }
  func.func @transform_2(%arg0: i32) -> (i32, i32) {
    %c0_i32 = arith.constant 0 : i32
    %c0_i32_0 = arith.constant 0 : i32
    %c0_i32_1 = arith.constant 0 : i32
    return %c0_i32, %c0_i32_0 : i32, i32
  }
  func.func @transform_3(%arg0: i32) -> (i32, i32) {
    %c0_i32 = arith.constant 0 : i32
    %c0_i32_0 = arith.constant 0 : i32
    return %arg0, %c0_i32 : i32, i32
  }
}

</mosaic_0001>

<bundles_post_ra>
// kernel: highway_pallas.1
= control target key start
LH: loop header
LB: loop body
LE: loop exit
PB: predicated region body
PF: predicated region fallthrough
CT: control target
= control target key end

     0   :  { %s372_s12 = smov 0   ;;  %s499_s0 = inlined_call_operand.vmem [shape: f32[16,128], index: 0, kind: input, shape index: {}]   ;;  %s500_s1 = inlined_call_operand.vmem [shape: f32[128,256], index: 1, kind: input, shape index: {}]   ;;  %s501_s2 = inlined_call_operand.vmem [shape: f32[1,256], index: 2, kind: input, shape index: {}]   ;;  %s502_s3 = inlined_call_operand.vmem [shape: f32[16,128], index: 3, kind: output, shape index: {}]  }
   0x1 LB: > { %s322_s13 = sadd.s32 4294967295, %s350_s12   ;;  %p326_p0 = scmp.ge.s32.totalorder %s350_s12, 1  ;;  %s350_s12 = sphi %s372_s12, %s13_s12  }
   0x2   : > { %p136_p1 = scmp.lt.s32.totalorder %s350_s12, 3 }
   0x4   : > { %p137_p2 = pnand %p326_p0, %p136_p1 }
   0x5   : > { %p158_p3 = scmp.lt.s32.totalorder (!%p137_p2), %s322_s13, 1 }
   0x6   : > { %140 = sbr.rel (%p137_p2) target bundleno = 204 (0xcc), region = 32 }
   0xb   : > { %v198_v0 = vld [vmem:[%s500_s1 + $0xf8] sm:$0xff]  ;;  %v196_v1 = vld [vmem:[%s500_s1 + $0xe8] sm:$0xff]  ;;  %v197_v4 = vld [vmem:[%s500_s1 + $0xf0] sm:$0xff]  ;;  %s504_s13 = smov (!%p158_p3, %s322_s13), 1 }
   0xc   : > { %225 = vmatpush.msra.mxu1 %v198_v0  ;;  %v194_v2 = vld [vmem:[%s500_s1 + $0xd8] sm:$0xff]  ;;  %v192_v3 = vld [vmem:[%s500_s1 + $0xc8] sm:$0xff]  ;;  %v195_v5 = vld [vmem:[%s500_s1 + $0xe0] sm:$0xff]  ;;  %205 = vmatpush.msra.mxu0 %v197_v4  ;;  %s327_s10 = sshll.u32 %s504_s13, 3 }
   0xd   : > { %v190_v6 = vld [vmem:[%s500_s1 + $0xb8] sm:$0xff]  ;;  %v193_v7 = vld [vmem:[%s500_s1 + $0xd0] sm:$0xff]  ;;  %v188_v8 = vld [vmem:[%s500_s1 + $0xa8] sm:$0xff]  ;;  %s161_s21 = scalar_lea.vmem %s499_s0, %s327_s10  ;;  %s165_s9 = scalar_lea.vmem %s502_s3, %s327_s10 }
   0xe   : > { %226 = vmatpush.msra.mxu1 %v196_v1  ;;  %206 = vmatpush.msra.mxu0 %v195_v5  ;;  %v191_v9 = vld [vmem:[%s500_s1 + $0xc0] sm:$0xff]  ;;  %v186_v10 = vld [vmem:[%s500_s1 + $0x98] sm:$0xff]  ;;  %v189_v11 = vld [vmem:[%s500_s1 + $0xb0] sm:$0xff] }
   0xf   : > { %v184_v12 = vld [vmem:[%s500_s1 + $0x88] sm:$0xff]  ;;  %v187_v13 = vld [vmem:[%s500_s1 + $0xa0] sm:$0xff]  ;;  %v182_v14 = vld [vmem:[%s500_s1 + $0x78] sm:$0xff] }
  0x10   : > { %227 = vmatpush.msra.mxu1 %v194_v2  ;;  %207 = vmatpush.msra.mxu0 %v193_v7  ;;  %v185_v15 = vld [vmem:[%s500_s1 + $0x90] sm:$0xff]  ;;  %v180_v16 = vld [vmem:[%s500_s1 + $0x68] sm:$0xff]  ;;  %v183_v17 = vld [vmem:[%s500_s1 + $0x80] sm:$0xff] }
  0x11   : > { %v178_v18 = vld [vmem:[%s500_s1 + $0x58] sm:$0xff]  ;;  %v181_v19 = vld [vmem:[%s500_s1 + $0x70] sm:$0xff]  ;;  %v176_v20 = vld [vmem:[%s500_s1 + $0x48] sm:$0xff] }
  0x12   : > { %228 = vmatpush.msra.mxu1 %v192_v3  ;;  %208 = vmatpush.msra.mxu0 %v191_v9  ;;  %v179_v21 = vld [vmem:[%s500_s1 + $0x60] sm:$0xff]  ;;  %v174_v22 = vld [vmem:[%s500_s1 + $0x38] sm:$0xff]  ;;  %v177_v23 = vld [vmem:[%s500_s1 + $0x50] sm:$0xff] }
  0x13   : > { %v172_v24 = vld [vmem:[%s500_s1 + $0x28] sm:$0xff]  ;;  %v175_v25 = vld [vmem:[%s500_s1 + $0x40] sm:$0xff]  ;;  %v170_v26 = vld [vmem:[%s500_s1 + $0x18] sm:$0xff] }
  0x14   : > { %229 = vmatpush.msra.mxu1 %v190_v6  ;;  %209 = vmatpush.msra.mxu0 %v189_v11  ;;  %v173_v27 = vld [vmem:[%s500_s1 + $0x30] sm:$0xff]  ;;  %v168_v28 = vld [vmem:[%s500_s1 + $0x8] sm:$0xff]  ;;  %v171_v29 = vld [vmem:[%s500_s1 + $0x20] sm:$0xff] }
  0x15   : > { %v166_v30 = vld [vmem:[%s161_s21] sm:$0xff]  ;;  %v169_v31 = vld [vmem:[%s500_s1 + $0x10] sm:$0xff] }
  0x16   : > { %230 = vmatpush.msra.mxu1 %v188_v8  ;;  %210 = vmatpush.msra.mxu0 %v187_v13  ;;  %v167_v32 = vld [vmem:[%s500_s1] sm:$0xff] }
  0x17   : > { %v199_v33 = vld [vmem:[%s501_s2] sm:$0x3] }
  0x18   : > { %231 = vmatpush.msra.mxu1 %v186_v10  ;;  %211 = vmatpush.msra.mxu0 %v185_v15  ;;  %v202_v34 = vperm.slane %v199_v33, 1  ;;  %v201_v40 = vperm.slane %v199_v33, 0 }
  0x1a   : > { %232 = vmatpush.msra.mxu1 %v184_v12  ;;  %212 = vmatpush.msra.mxu0 %v183_v17 }
  0x1c   : > { %233 = vmatpush.msra.mxu1 %v182_v14  ;;  %213 = vmatpush.msra.mxu0 %v181_v19 }
  0x1e   : > { %234 = vmatpush.msra.mxu1 %v180_v16  ;;  %214 = vmatpush.msra.mxu0 %v179_v21 }
  0x20   : > { %235 = vmatpush.msra.mxu1 %v178_v18  ;;  %215 = vmatpush.msra.mxu0 %v177_v23 }
  0x22   : > { %236 = vmatpush.msra.mxu1 %v176_v20  ;;  %216 = vmatpush.msra.mxu0 %v175_v25 }
  0x24   : > { %237 = vmatpush.msra.mxu1 %v174_v22  ;;  %217 = vmatpush.msra.mxu0 %v173_v27 }
  0x26   : > { %238 = vmatpush.msra.mxu1 %v172_v24  ;;  %218 = vmatpush.msra.mxu0 %v171_v29 }
  0x28   : > { %239 = vmatpush.msra.mxu1 %v170_v26  ;;  %219 = vmatpush.msra.mxu0 %v169_v31 }
  0x2a   : > { %240 = vmatpush.msra.mxu1 %v168_v28  ;;  %220 = vmatpush.msra.mxu0 %v167_v32 }
  0x2b   : > { %241 = vmatmul.f32.vlgmr.msra.gmra.mxu1 %v166_v30  ;;  %221 = vmatmul.f32.vlgmr.msra.gmra.mxu0 %v166_v30 }
  0xa8   : > { %v242_v35 = vpop.f32.mrf.mxu1  ;;  %v222_v41 = vpop.f32.mrf.mxu0 }
  0xa9   : > { %v243_v36 = vadd.f32 %v242_v35, %v202_v34  ;;  %v223_v42 = vadd.f32 %v222_v41, %v201_v40 }
  0xab   : > { %v329_v37 = vmul.f32 -1.442695, %v243_v36  ;;  %v245_v46 = vmax.f32 %v223_v42, 0.0 }
  0xad   : > { %340 = vpow2.f32 %v329_v37  ;;  %v265_v51 = vsub.f32 %v245_v46, %v166_v30 }
  0xb3   : > { %v341_v38 = vpop.eup %340 }
  0xb4   : > { %v249_v39 = vadd.f32 1.0, %v341_v38 }
  0xb6   : > { %342 = vrcp.f32 %v249_v39  ;;  %v261_v47 = vand.u32 2147483648, %v249_v39  ;;  %v259_v49 = vand.u32 2147483647, %v249_v39  ;;  %vm255_vm1 = vweird.f32 %v249_v39 }
  0xb8   : > { %v262_v52 = vor.u32 1.1754944e-38, %v261_v47  ;;  %vm260_vm3 = vcmp.eq.f32.partialorder %v259_v49, 8.507059e+37 }
  0xbc   : > { %v343_v43 = vpop.eup %342 }
  0xbd   : > { %v251_v44 = vmul.f32 %v343_v43, %v249_v39  ;;  %vm256_vm0 = vweird.f32 %v343_v43 }
  0xbe   : > { %vm257_vm2 = vmor %vm255_vm1, %vm256_vm0 }
  0xbf   : > { %v252_v45 = vsub.f32 1.0, %v251_v44 }
  0xc1   : > { %v253_v48 = vmul.f32 %v343_v43, %v252_v45 }
  0xc3   : > { %v254_v50 = vadd.f32 %v343_v43, %v253_v48 }
  0xc5   : > { %v258_v53 = vsel %vm257_vm2, %v343_v43, %v254_v50 }
  0xc6   : > { %v263_v54 = vsel %vm260_vm3, %v262_v52, %v258_v53 }
  0xc7   : > { %v266_v55 = vmul.f32 %v265_v51, %v263_v54 }
  0xc9   : > { %v267_v56 = vadd.f32 %v266_v55, %v166_v30 }
  0xcb   : > { %268 = vst [vmem:[%s165_s9] sm:$0xff] %v267_v56 }
  0xcc PF: > { %s13_s12 = sadd.s32 1, %s350_s12  }
  0xcd   : > { %p10_p4 = scmp.ge.s32.totalorder %s13_s12, 4  }
  0xcf   :  { %12 = sbr.rel (!%p10_p4) target bundleno = 1 (0x1), region = 62 }

</bundles_post_ra>
